<compile_context>
chip_gen: v6e
topology: v6e:2x2x1
jax: 0.10.0
libtpu: 0.0.40
codegen_flags: <defaults>
</compile_context>

<pallas_src>
import jax
import jax.numpy as jnp
from jax.experimental import pallas as pl
from jax.experimental.pallas import tpu as pltpu

LANE = 128
SUBLANE = 8
BF16_PACK = 16  # bf16 sublane packing unit

H1_PAD = 128   # hidden 100 -> 128
H2_PAD = 512   # hidden 500 -> 512


def _round_up(x, m):
    return (x + m - 1) // m * m


def _tensorcores_per_chip():
    """Best-effort TC-per-chip detection (v7x has 2, v5e/v6e have 1)."""
    try:
        kind = jax.devices()[0].device_kind.lower()
    except Exception:  # pragma: no cover - defensive
        return 1
    return 2 if "7" in kind else 1


def dqn_kernel(x_ref, w1_ref, b1_ref, w2_ref, b2_ref, w3_ref, b3_ref, out_ref):
    # Layer 1: Linear(S -> 128) + ReLU.  bf16 MXU matmul, f32 accumulate,
    # bf16 cast fused into the ReLU epilogue (no f32 intermediate kept).
    h1 = jnp.dot(x_ref[...], w1_ref[...], preferred_element_type=jnp.float32)
    h1 = jnp.maximum(h1 + b1_ref[...], 0.0).astype(jnp.bfloat16)
    # Layer 2: Linear(128 -> 512) + ReLU.
    h2 = jnp.dot(h1, w2_ref[...], preferred_element_type=jnp.float32)
    h2 = jnp.maximum(h2 + b2_ref[...], 0.0).astype(jnp.bfloat16)
    # Layer 3: Linear(512 -> A_pad), no activation; bias add in f32.
    out = jnp.dot(h2, w3_ref[...], preferred_element_type=jnp.float32)
    out_ref[...] = (out + b3_ref[...]).astype(out_ref.dtype)


def prepare_params(w1, b1, w2, b2, w3, b3):
    """Pad module-shaped f32 params to TPU-friendly shapes; weights -> bf16.

    Zero padding keeps the math identical: padded hidden columns stay 0 after
    ReLU, padded output columns are 0 and sliced away in dqn_forward.
    The state dim is only padded to a multiple of 16 (bf16 sublane pack), not
    to 128 lanes -- the MXU zero-pads K internally.
    Done once, outside the per-step call.
    """
    state_space = w1.shape[0]
    action_space = w3.shape[1]
    s_pad = _round_up(state_space, BF16_PACK)
    a_pad = _round_up(action_space, LANE)

    def pad_w(w, rows, cols, dtype):
        out = jnp.zeros((rows, cols), jnp.float32)
        out = out.at[: w.shape[0], : w.shape[1]].set(w.astype(jnp.float32))
        return out.astype(dtype)

    w1p = pad_w(w1, s_pad, H1_PAD, jnp.bfloat16)
    w2p = pad_w(w2, H1_PAD, H2_PAD, jnp.bfloat16)
    w3p = pad_w(w3, H2_PAD, a_pad, jnp.bfloat16)
    b1p = pad_w(b1.reshape(1, -1), 1, H1_PAD, jnp.float32)
    b2p = pad_w(b2.reshape(1, -1), 1, H2_PAD, jnp.float32)
    b3p = pad_w(b3.reshape(1, -1), 1, a_pad, jnp.float32)
    return (w1p, b1p, w2p, b2p, w3p, b3p)


def dqn_forward(x, padded_params, *, action_space, max_tile_b=512,
                store_bf16=True):
    """Forward pass. x: (B, state_space) float. Returns (B, action_space) f32."""
    w1, b1, w2, b2, w3, b3 = padded_params
    B, S = x.shape
    s_pad = w1.shape[0]
    a_pad = w3.shape[1]
    assert S <= s_pad

    # Adaptive batch tiling:
    #  * >= 2 grid steps once B >= 16 on v7x so both TensorCores get work
    #    (batch axis is "parallel"); single step on single-TC v5e/v6e.
    #  * cap tile_b at max_tile_b so large batches still pipeline, amortizing
    #    the ~0.35us per-step overhead without blowing up batch padding.
    min_tiles = _tensorcores_per_chip() if B >= 16 else 1
    n_tiles = max(min_tiles, pl.cdiv(B, max_tile_b))
    tile_b = _round_up(pl.cdiv(B, n_tiles), SUBLANE)
    b_pad = tile_b * n_tiles

    x_bf16 = x.astype(jnp.bfloat16)
    if b_pad != B or s_pad != S:
        x_in = jnp.zeros((b_pad, s_pad), jnp.bfloat16).at[:B, :S].set(x_bf16)
    else:
        x_in = x_bf16

    out_dtype = jnp.bfloat16 if store_bf16 else jnp.float32
    grid = (n_tiles,)

    flops = 2 * b_pad * (s_pad * H1_PAD + H1_PAD * H2_PAD + H2_PAD * a_pad)
    bytes_accessed = (
        x_in.size * x_in.dtype.itemsize
        + sum(p.size * p.dtype.itemsize for p in padded_params)
        + b_pad * a_pad * jnp.dtype(out_dtype).itemsize
    )

    out = pl.pallas_call(
        dqn_kernel,
        out_shape=jax.ShapeDtypeStruct((b_pad, a_pad), out_dtype),
        grid_spec=pltpu.PrefetchScalarGridSpec(
            num_scalar_prefetch=0,
            grid=grid,
            in_specs=[
                # Activations: tiled over batch, pipelined/double-buffered.
                pl.BlockSpec((tile_b, s_pad), lambda i: (i, 0)),
                # Weights/biases: constant index_map -> fetched once, stay
                # VMEM-resident across grid steps.
                pl.BlockSpec((s_pad, H1_PAD), lambda i: (0, 0)),
                pl.BlockSpec((1, H1_PAD), lambda i: (0, 0)),
                pl.BlockSpec((H1_PAD, H2_PAD), lambda i: (0, 0)),
                pl.BlockSpec((1, H2_PAD), lambda i: (0, 0)),
                pl.BlockSpec((H2_PAD, a_pad), lambda i: (0, 0)),
                pl.BlockSpec((1, a_pad), lambda i: (0, 0)),
            ],
            out_specs=pl.BlockSpec((tile_b, a_pad), lambda i: (i, 0)),
        ),
        compiler_params=pltpu.CompilerParams(
            dimension_semantics=("parallel",),
            # Covers tile_b sweeps up to ~2048 even on v5e's 16 MiB default
            # scoped VMEM; well under physical VMEM on all generations.
            vmem_limit_bytes=32 * 1024 * 1024,
        ),
        cost_estimate=pl.CostEstimate(
            flops=flops, transcendentals=0, bytes_accessed=bytes_accessed
        ),
    )(x_in, w1, b1, w2, b2, w3, b3)

    # Padded batch rows / action columns carry garbage by construction; this
    # slice is what makes the result correct.
    return out[:B, :action_space].astype(jnp.float32)


def init_params(key, state_space, action_space):
    """Deterministic synthetic params with the same shapes as the nn.Module."""
    ks = jax.random.split(key, 6)

    def linear(kw, kb, fan_in, fan_out):
        # PyTorch Linear default init: U(-1/sqrt(fan_in), 1/sqrt(fan_in)).
        bound = 1.0 / jnp.sqrt(jnp.float32(fan_in))
        w = jax.random.uniform(kw, (fan_in, fan_out), jnp.float32, -bound, bound)
        b = jax.random.uniform(kb, (1, fan_out), jnp.float32, -bound, bound)
        return w, b

    w1, b1 = linear(ks[0], ks[1], state_space, 100)
    w2, b2 = linear(ks[2], ks[3], 100, 500)
    w3, b3 = linear(ks[4], ks[5], 500, action_space)
    return w1, b1, w2, b2, w3, b3


if __name__ == "__main__":
    key = jax.random.PRNGKey(0)
    k_x, k_p = jax.random.split(key)

    batch = 2
    state_space = 16
    action_space = 4

    x = jax.random.normal(k_x, (batch, state_space), dtype=jnp.float32)
    params = init_params(k_p, state_space, action_space)
    padded = prepare_params(*params)

    out = dqn_forward(x, padded, action_space=action_space)
    jax.block_until_ready(out)

    # Pure-JAX f32 reference of the module's forward semantics.
    w1, b1, w2, b2, w3, b3 = params
    ref = jnp.maximum(x @ w1 + b1, 0.0)
    ref = jnp.maximum(ref @ w2 + b2, 0.0)
    ref = ref @ w3 + b3

    assert out.shape == (batch, action_space)
    # bf16 weights/activations/output (f32 accumulate) -> loosened tolerance.
    assert jnp.allclose(out, ref, atol=5e-2, rtol=5e-2), (
        f"max abs err {jnp.max(jnp.abs(out - ref))}"
    )
    print("KERNEL_OK")
</pallas_src>

<mosaic_0001>
module attributes {stable_mosaic.version = 11 : i64} {
  func.func @dqn_kernel(%arg0: i32, %arg1: memref<8x16xbf16, #tpu.memory_space<vmem>>, %arg2: memref<16x128xbf16, #tpu.memory_space<vmem>>, %arg3: memref<1x128xf32, #tpu.memory_space<vmem>>, %arg4: memref<128x512xbf16, #tpu.memory_space<vmem>>, %arg5: memref<1x512xf32, #tpu.memory_space<vmem>>, %arg6: memref<512x128xbf16, #tpu.memory_space<vmem>>, %arg7: memref<1x128xf32, #tpu.memory_space<vmem>>, %arg8: memref<8x128xbf16, #tpu.memory_space<vmem>>) attributes {dimension_semantics = [#tpu.dimension_semantics<parallel>], iteration_bounds = array<i64: 1>, scalar_prefetch = 0 : i64, scratch_operands = 0 : i64, tpu.core_type = #tpu.core_type<tc>, window_params = [{transform_indices = @transform_0, window_bounds = array<i64: 8, 16>}, {pipeline_mode = #tpu.pipeline_mode<synchronous>, transform_indices = @transform_1, window_bounds = array<i64: 16, 128>}, {pipeline_mode = #tpu.pipeline_mode<synchronous>, transform_indices = @transform_2, window_bounds = array<i64: 1, 128>}, {pipeline_mode = #tpu.pipeline_mode<synchronous>, transform_indices = @transform_3, window_bounds = array<i64: 128, 512>}, {pipeline_mode = #tpu.pipeline_mode<synchronous>, transform_indices = @transform_4, window_bounds = array<i64: 1, 512>}, {pipeline_mode = #tpu.pipeline_mode<synchronous>, transform_indices = @transform_5, window_bounds = array<i64: 512, 128>}, {pipeline_mode = #tpu.pipeline_mode<synchronous>, transform_indices = @transform_6, window_bounds = array<i64: 1, 128>}, {transform_indices = @transform_7, window_bounds = array<i64: 8, 128>}]} {
    %c0 = arith.constant 0 : index
    %c0_0 = arith.constant 0 : index
    %0 = vector.load %arg1[%c0, %c0_0] : memref<8x16xbf16, #tpu.memory_space<vmem>>, vector<8x16xbf16>
    %c0_1 = arith.constant 0 : index
    %c0_2 = arith.constant 0 : index
    %1 = vector.load %arg2[%c0_1, %c0_2] : memref<16x128xbf16, #tpu.memory_space<vmem>>, vector<16x128xbf16>
    %cst = arith.constant dense<0.000000e+00> : vector<8x128xf32>
    %2 = tpu.matmul %0, %1, %cst {dimension_numbers = #tpu.dot_dimension_numbers<[1], [0], [0], [1], [0, 0, 1, 1], [], []>} : vector<8x16xbf16>, vector<16x128xbf16>, vector<8x128xf32> -> vector<8x128xf32>
    %c0_3 = arith.constant 0 : index
    %c0_4 = arith.constant 0 : index
    %3 = vector.load %arg3[%c0_3, %c0_4] : memref<1x128xf32, #tpu.memory_space<vmem>>, vector<1x128xf32>
    %4 = vector.broadcast %3 : vector<1x128xf32> to vector<8x128xf32>
    %5 = arith.addf %2, %4 : vector<8x128xf32>
    %cst_5 = arith.constant 0.000000e+00 : f32
    %6 = vector.broadcast %cst_5 : f32 to vector<8x128xf32>
    %7 = arith.maximumf %5, %6 : vector<8x128xf32>
    %8 = arith.truncf %7 : vector<8x128xf32> to vector<8x128xbf16>
    %c0_6 = arith.constant 0 : index
    %c0_7 = arith.constant 0 : index
    %9 = vector.load %arg4[%c0_6, %c0_7] : memref<128x512xbf16, #tpu.memory_space<vmem>>, vector<128x512xbf16>
    %cst_8 = arith.constant dense<0.000000e+00> : vector<8x512xf32>
    %10 = tpu.matmul %8, %9, %cst_8 {dimension_numbers = #tpu.dot_dimension_numbers<[1], [0], [0], [1], [0, 0, 1, 1], [], []>} : vector<8x128xbf16>, vector<128x512xbf16>, vector<8x512xf32> -> vector<8x512xf32>
    %c0_9 = arith.constant 0 : index
    %c0_10 = arith.constant 0 : index
    %11 = vector.load %arg5[%c0_9, %c0_10] : memref<1x512xf32, #tpu.memory_space<vmem>>, vector<1x512xf32>
    %12 = vector.broadcast %11 : vector<1x512xf32> to vector<8x512xf32>
    %13 = arith.addf %10, %12 : vector<8x512xf32>
    %cst_11 = arith.constant 0.000000e+00 : f32
    %14 = vector.broadcast %cst_11 : f32 to vector<8x512xf32>
    %15 = arith.maximumf %13, %14 : vector<8x512xf32>
    %16 = arith.truncf %15 : vector<8x512xf32> to vector<8x512xbf16>
    %c0_12 = arith.constant 0 : index
    %c0_13 = arith.constant 0 : index
    %17 = vector.load %arg6[%c0_12, %c0_13] : memref<512x128xbf16, #tpu.memory_space<vmem>>, vector<512x128xbf16>
    %cst_14 = arith.constant dense<0.000000e+00> : vector<8x128xf32>
    %18 = tpu.matmul %16, %17, %cst_14 {dimension_numbers = #tpu.dot_dimension_numbers<[1], [0], [0], [1], [0, 0, 1, 1], [], []>} : vector<8x512xbf16>, vector<512x128xbf16>, vector<8x128xf32> -> vector<8x128xf32>
    %c0_15 = arith.constant 0 : index
    %c0_16 = arith.constant 0 : index
    %19 = vector.load %arg7[%c0_15, %c0_16] : memref<1x128xf32, #tpu.memory_space<vmem>>, vector<1x128xf32>
    %20 = vector.broadcast %19 : vector<1x128xf32> to vector<8x128xf32>
    %21 = arith.addf %18, %20 : vector<8x128xf32>
    %22 = arith.truncf %21 : vector<8x128xf32> to vector<8x128xbf16>
    %c0_17 = arith.constant 0 : index
    %c0_18 = arith.constant 0 : index
    %23 = vector.load %arg8[%c0_17, %c0_18] : memref<8x128xbf16, #tpu.memory_space<vmem>>, vector<8x128xbf16>
    tpu.vector_store %arg8[%c0_17, %c0_18], %22 {strides = array<i32>} : memref<8x128xbf16, #tpu.memory_space<vmem>>, vector<8x128xbf16>,
    return
  }
  func.func @transform_0(%arg0: i32) -> (i32, i32) {
    %c0_i32 = arith.constant 0 : i32
    %c0_i32_0 = arith.constant 0 : i32
    return %arg0, %c0_i32 : i32, i32
  }
  func.func @transform_1(%arg0: i32) -> (i32, i32) {
    %c0_i32 = arith.constant 0 : i32
    %c0_i32_0 = arith.constant 0 : i32
    %c0_i32_1 = arith.constant 0 : i32
    return %c0_i32, %c0_i32_0 : i32, i32
  }
  func.func @transform_2(%arg0: i32) -> (i32, i32) {
    %c0_i32 = arith.constant 0 : i32
    %c0_i32_0 = arith.constant 0 : i32
    %c0_i32_1 = arith.constant 0 : i32
    return %c0_i32, %c0_i32_0 : i32, i32
  }
  func.func @transform_3(%arg0: i32) -> (i32, i32) {
    %c0_i32 = arith.constant 0 : i32
    %c0_i32_0 = arith.constant 0 : i32
    %c0_i32_1 = arith.constant 0 : i32
    return %c0_i32, %c0_i32_0 : i32, i32
  }
  func.func @transform_4(%arg0: i32) -> (i32, i32) {
    %c0_i32 = arith.constant 0 : i32
    %c0_i32_0 = arith.constant 0 : i32
    %c0_i32_1 = arith.constant 0 : i32
    return %c0_i32, %c0_i32_0 : i32, i32
  }
  func.func @transform_5(%arg0: i32) -> (i32, i32) {
    %c0_i32 = arith.constant 0 : i32
    %c0_i32_0 = arith.constant 0 : i32
    %c0_i32_1 = arith.constant 0 : i32
    return %c0_i32, %c0_i32_0 : i32, i32
  }
  func.func @transform_6(%arg0: i32) -> (i32, i32) {
    %c0_i32 = arith.constant 0 : i32
    %c0_i32_0 = arith.constant 0 : i32
    %c0_i32_1 = arith.constant 0 : i32
    return %c0_i32, %c0_i32_0 : i32, i32
  }
  func.func @transform_7(%arg0: i32) -> (i32, i32) {
    %c0_i32 = arith.constant 0 : i32
    %c0_i32_0 = arith.constant 0 : i32
    return %arg0, %c0_i32 : i32, i32
  }
}

</mosaic_0001>

<bundles_post_ra>
// kernel: tpu_custom_call.1
= control target key start
LH: loop header
LB: loop body
LE: loop exit
PB: predicated region body
PF: predicated region fallthrough
CT: control target
= control target key end

     0   :  { %12 = vsyncpa [#allocation3], 0  ;;  %s1212_s0 = inlined_call_operand.hbm [shape: bf16[8,16], index: 0, kind: input, shape index: {}]   ;;  %s1213_s1 = inlined_call_operand.hbm [shape: bf16[16,128], index: 1, kind: input, shape index: {}]   ;;  %s1214_s2 = inlined_call_operand.vmem [shape: f32[1,128], index: 2, kind: input, shape index: {}]   ;;  %s1215_s3 = inlined_call_operand.hbm [shape: bf16[128,512], index: 3, kind: input, shape index: {}]   ;;  %s1216_s4 = inlined_call_operand.vmem [shape: f32[1,512], index: 4, kind: input, shape index: {}]   ;;  %s1217_s5 = inlined_call_operand.hbm [shape: bf16[512,128], index: 5, kind: input, shape index: {}]   ;;  %s1218_s6 = inlined_call_operand.vmem [shape: f32[1,128], index: 6, kind: input, shape index: {}]   ;;  %s1219_s7 = inlined_call_operand.hbm [shape: bf16[8,128], index: 7, kind: output, shape index: {}]  }
   0x1   :  { %13 = vsyncpa [#allocation6], 0 }
   0x2   :  { %14 = vsyncpa [#allocation9], 0 }
   0x3   :  { %15 = vsyncpa [#allocation4], 0  ;;  %s1130_s24 = smov [#allocation5]  }
   0x4   :  { %s31_s25 = sshll.u32 %s1130_s24, 4  ;;  %s32_s25 = int_to_ptr.vmem [resolvable:$true] %s31_s25 }
   0x5   :  { %s1030_s26 = scalar_lea.vmem %s32_s25, 128  ;;  %p1035_p1 = scmp.lt.s32.totalorder %s32_s25, %s32_s25 }
   0x6   :  { %p1031_p0 = scmp.ne.s32.totalorder %s32_s25, %s1030_s26  ;;  %p1036_p2 = scmp.lt.s32.totalorder %s1030_s26, %s1030_s26 }
   0x8   :  { %p1037_p3 = por %p1036_p2, %p1035_p1 }
   0xa   :  { %p1038_p4 = pnand %p1037_p3, %p1031_p0 }
   0xc   :  { %1041 = shalt.err (!%p1038_p4)
}
   0xd   :  { %s1131_s27 = smov 64   ;;  %s1132_s28 = smov 4  }
   0xe   :  { %37 = dma.hbm_to_vmem [thread:$0]  %s1213_s1, 128, %s32_s25, [#allocation6], %s1131_s27, %s1131_s27, %s1132_s28  }
   0xf   :  { %s1133_s8 = smov [#allocation2]   ;;  %s1134_s10 = smov [#allocation7]  }
  0x10   :  { %s22_s9 = sshll.u32 %s1133_s8, 4  ;;  %s45_s11 = sshll.u32 %s1134_s10, 4  ;;  %s23_s9 = int_to_ptr.vmem [resolvable:$true] %s22_s9  ;;  %s46_s11 = int_to_ptr.vmem [resolvable:$true] %s45_s11 }
  0x11   :  { %s1050_s12 = scalar_lea.vmem %s23_s9, 64  ;;  %p1055_p6 = scmp.lt.s32.totalorder %s23_s9, %s23_s9 }
  0x12   :  { %p1051_p5 = scmp.ne.s32.totalorder %s23_s9, %s1050_s12  ;;  %p1056_p7 = scmp.lt.s32.totalorder %s1050_s12, %s1050_s12 }
  0x14   :  { %p1057_p8 = por %p1056_p7, %p1055_p6 }
  0x16   :  { %p1058_p9 = pnand %p1057_p8, %p1051_p5 }
  0x18   :  { %1061 = shalt.err (!%p1058_p9)
}
  0x19   :  { %25 = dma.hbm_to_vmem [thread:$0]  %s1212_s0, 64, %s23_s9, [#allocation3]  }
  0x1a   :  { %s1070_s15 = scalar_lea.vmem %s46_s11, 4096  ;;  %p1075_p11 = scmp.lt.s32.totalorder %s46_s11, %s46_s11 }
  0x1b   :  { %p1071_p10 = scmp.ne.s32.totalorder %s46_s11, %s1070_s15  ;;  %p1076_p12 = scmp.lt.s32.totalorder %s1070_s15, %s1070_s15 }
  0x1d   :  { %p1077_p13 = por %p1076_p12, %p1075_p11 }
  0x1f   :  { %p1078_p0 = pnand %p1077_p13, %p1071_p10 }
  0x21   :  { %1081 = shalt.err (!%p1078_p0)
}
  0x22   :  { %s1135_s1 = smov 256   ;;  %s1136_s16 = smov 16  }
  0x23   :  { %51 = dma.hbm_to_vmem [thread:$0]  %s1215_s3, 4096, %s46_s11, [#allocation6], %s1135_s1, %s1135_s1, %s1136_s16  }
  0x24   :  { %s1137_s19 = smov [#allocation8]  }
  0x25   :  { %s59_s20 = sshll.u32 %s1137_s19, 4  ;;  %s60_s20 = int_to_ptr.vmem [resolvable:$true] %s59_s20 }
  0x26   :  { %s1090_s21 = scalar_lea.vmem %s60_s20, 4096  ;;  %p1095_p2 = scmp.lt.s32.totalorder %s60_s20, %s60_s20 }
  0x27   :  { %p1091_p1 = scmp.ne.s32.totalorder %s60_s20, %s1090_s21  ;;  %p1096_p3 = scmp.lt.s32.totalorder %s1090_s21, %s1090_s21 }
  0x29   :  { %p1097_p4 = por %p1096_p3, %p1095_p2 }
  0x2b   :  { %p1098_p5 = pnand %p1097_p4, %p1091_p1 }
  0x2d   :  { %1101 = shalt.err (!%p1098_p5)
}
  0x2e   :  { %65 = dma.hbm_to_vmem [thread:$0]  %s1217_s5, 4096, %s60_s20, [#allocation9], %s1131_s27, %s1131_s27, %s1132_s28  }
  0x2f   :  { %1122 = dma.done.wait [#allocation3], 64  }
  0x30   :  { %1123 = vsyncadd [#allocation3], 4294967232 }
  0x31   :  { %1124 = dma.done.wait [#allocation6], 4224  }
  0x32   :  { %1125 = vsyncadd [#allocation6], 4294963072 }
  0x33   :  { %1126 = dma.done.wait [#allocation9], 4096  }
  0x34   :  { %1127 = vsyncadd [#allocation9], 4294963200  ;;  %v1138_v0 = vmov 0.0   ;;  %vm1139_vm0 = vmmov 0   ;;  %v941_v1 = vld [vmem:[#allocation5] sm:$0xff]   ;;  %vm97_vm1 = vcmask 130048  }
  0x35   :  { %923 = vmatprep.subr.bf16.mxu0 %v1138_v0  ;;  %925 = vmatprep.mubr.msk.bf16.mxu0 %vm1139_vm0, %v1138_v0  ;;  %v81_v2 = vld [vmem:[#allocation2] sm:$0xf]  ;;  %v944_v4 = vld [vmem:[#allocation7 + $0xe8] ss:$16 sps:$4 sm:$0xff]   ;;  %v946_v5 = vld [vmem:[#allocation7 + $0xec] ss:$16 sps:$4 sm:$0xff]  }
  0x36   :  { %924 = vmatpush3.bf16.msra.mxu0 %v941_v1  ;;  %v942_v3 = vld [vmem:[#allocation7 + $0xe4] ss:$16 sps:$4 sm:$0xff]   ;;  %v947_v6 = vld [vmem:[#allocation7 + $0xe0] ss:$16 sps:$4 sm:$0xff]   ;;  %v950_v8 = vld [vmem:[#allocation7 + $0xc8] ss:$16 sps:$4 sm:$0xff]  }
  0x37   :  { %357 = vmatprep.subr.bf16.mxu1 %v942_v3  ;;  %v948_v7 = vld [vmem:[#allocation7 + $0xc4] ss:$16 sps:$4 sm:$0xff]   ;;  %398 = vmatprep.subr.bf16.mxu0 %v946_v5  ;;  %v952_v9 = vld [vmem:[#allocation7 + $0xcc] ss:$16 sps:$4 sm:$0xff]   ;;  %v953_v10 = vld [vmem:[#allocation7 + $0xc0] ss:$16 sps:$4 sm:$0xff]  }
  0x38   :  { %358 = vmatpush1.bf16.msra.mxu1 %v947_v6  ;;  %v954_v11 = vld [vmem:[#allocation7 + $0xa4] ss:$16 sps:$4 sm:$0xff]   ;;  %v958_v12 = vld [vmem:[#allocation7 + $0xac] ss:$16 sps:$4 sm:$0xff]   ;;  %v956_v13 = vld [vmem:[#allocation7 + $0xa8] ss:$16 sps:$4 sm:$0xff]  }
  0x39   :  { %926 = vmatmul.mubr.msk.bf16.vlgmr.msra.gmra.mxu0 %vm97_vm1, %v81_v2  ;;  %359 = vmatprep.subr.bf16.mxu1 %v948_v7  ;;  %v959_v14 = vld [vmem:[#allocation7 + $0xa0] ss:$16 sps:$4 sm:$0xff]   ;;  %v960_v15 = vld [vmem:[#allocation7 + $0x84] ss:$16 sps:$4 sm:$0xff]   ;;  %v964_v16 = vld [vmem:[#allocation7 + $0x8c] ss:$16 sps:$4 sm:$0xff]  }
  0x3a   :  { %399 = vmatpush1.bf16.msra.mxu0 %v944_v4  ;;  %v962_v17 = vld [vmem:[#allocation7 + $0x88] ss:$16 sps:$4 sm:$0xff]   ;;  %v965_v18 = vld [vmem:[#allocation7 + $0x80] ss:$16 sps:$4 sm:$0xff]   ;;  %v966_v19 = vld [vmem:[#allocation7 + $0x64] ss:$16 sps:$4 sm:$0xff]  }
  0x3b   :  { %400 = vmatprep.subr.bf16.mxu0 %v952_v9  ;;  %v970_v20 = vld [vmem:[#allocation7 + $0x6c] ss:$16 sps:$4 sm:$0xff]   ;;  %v968_v21 = vld [vmem:[#allocation7 + $0x68] ss:$16 sps:$4 sm:$0xff]   ;;  %v971_v22 = vld [vmem:[#allocation7 + $0x60] ss:$16 sps:$4 sm:$0xff]  }
  0x3c   :  { %360 = vmatpush1.bf16.msra.mxu1 %v953_v10  ;;  %v972_v23 = vld [vmem:[#allocation7 + $0x44] ss:$16 sps:$4 sm:$0xff]   ;;  %v976_v24 = vld [vmem:[#allocation7 + $0x4c] ss:$16 sps:$4 sm:$0xff]   ;;  %v974_v25 = vld [vmem:[#allocation7 + $0x48] ss:$16 sps:$4 sm:$0xff]  }
  0x3d   :  { %361 = vmatprep.subr.bf16.mxu1 %v954_v11  ;;  %v977_v26 = vld [vmem:[#allocation7 + $0x40] ss:$16 sps:$4 sm:$0xff]   ;;  %v978_v27 = vld [vmem:[#allocation7 + $0x24] ss:$16 sps:$4 sm:$0xff]   ;;  %v982_v28 = vld [vmem:[#allocation7 + $0x2c] ss:$16 sps:$4 sm:$0xff]  }
  0x3e   :  { %401 = vmatpush1.bf16.msra.mxu0 %v950_v8  ;;  %v980_v29 = vld [vmem:[#allocation7 + $0x28] ss:$16 sps:$4 sm:$0xff]   ;;  %v983_v30 = vld [vmem:[#allocation7 + $0x20] ss:$16 sps:$4 sm:$0xff]   ;;  %v984_v31 = vld [vmem:[#allocation7 + $0x4] ss:$16 sps:$4 sm:$0xff]  }
  0x3f   :  { %402 = vmatprep.subr.bf16.mxu0 %v958_v12  ;;  %v988_v32 = vld [vmem:[#allocation7 + $0xc] ss:$16 sps:$4 sm:$0xff]   ;;  %v986_v33 = vld [vmem:[#allocation7 + $0x8] ss:$16 sps:$4 sm:$0xff]   ;;  %v989_v34 = vld [vmem:[#allocation7] ss:$16 sps:$4 sm:$0xff]   ;;  %v177_v12 = vlaneseq }
  0x40   :  { %362 = vmatpush1.bf16.msra.mxu1 %v959_v14  ;;  %v1140_v35 = vmov 0   ;;  %v990_v36 = vld [vmem:[#allocation8 + $0x78] sm:$0xff]   ;;  %v809_v38 = vld [vmem:[%s1214_s2] ss:$0 sm:$0xff]  ;;  %v998_v52 = vld [vmem:[#allocation8 + $0x68] sm:$0xff]   ;;  %s1141_s25 = smov [#allocation10]  }
  0x41   :  { %363 = vmatprep.subr.bf16.mxu1 %v960_v15  ;;  %389 = vmatprep.mubr.bf16.mxu1 %v1140_v35  ;;  %v991_v37 = vld [vmem:[#allocation8 + $0xf8] sm:$0xff]   ;;  %v994_v47 = vld [vmem:[#allocation8 + $0x70] sm:$0xff]   ;;  %v999_v53 = vld [vmem:[#allocation8 + $0xe8] sm:$0xff]   ;;  %s798_s26 = sshll.u32 %s1141_s25, 4  ;;  %s799_s26 = int_to_ptr.vmem [resolvable:$true] %s798_s26 }
  0x42   :  { %403 = vmatpush1.bf16.msra.mxu0 %v956_v13  ;;  %430 = vmatprep.mubr.bf16.mxu0 %v1140_v35  ;;  %v992_v44 = vld [vmem:[#allocation8 + $0x38] sm:$0xff]   ;;  %v995_v48 = vld [vmem:[#allocation8 + $0xf0] sm:$0xff]   ;;  %v1000_v54 = vld [vmem:[#allocation8 + $0x28] sm:$0xff]   ;;  %v178_v13 = vshrl.u32 %v177_v12, 7  ;;  %s1102_s27 = scalar_lea.vmem %s799_s26, 64  ;;  %p1107_p7 = scmp.lt.s32.totalorder %s799_s26, %s799_s26 }
  0x43   :  { %404 = vmatprep.subr.bf16.mxu0 %v964_v16  ;;  %v993_v45 = vld [vmem:[#allocation8 + $0xb8] sm:$0xff]   ;;  %v996_v50 = vld [vmem:[#allocation8 + $0x30] sm:$0xff]   ;;  %v1001_v55 = vld [vmem:[#allocation8 + $0xa8] sm:$0xff]   ;;  %p1103_p6 = scmp.ne.s32.totalorder %s799_s26, %s1102_s27  ;;  %p1108_p8 = scmp.lt.s32.totalorder %s1102_s27, %s1102_s27 }
  0x44   :  { %364 = vmatpush1.bf16.msra.mxu1 %v965_v18  ;;  %v997_v51 = vld [vmem:[#allocation8 + $0xb0] sm:$0xff]   ;;  %v1002_v56 = vld [vmem:[#allocation8 + $0x60] sm:$0xff]   ;;  %v1006_v60 = vld [vmem:[#allocation8 + $0x58] sm:$0xff]   ;;  %v179_v14 = vsub.s32 0, %v178_v13  ;;  %v187_v15 = vsub.s32 2, %v178_v13  ;;  %v191_v18 = vsub.s32 3, %v178_v13 }
  0x45   :  { %365 = vmatprep.subr.bf16.mxu1 %v966_v19  ;;  %v1003_v57 = vld [vmem:[#allocation8 + $0xe0] sm:$0xff]   ;;  %v1007_v61 = vld [vmem:[#allocation8 + $0xd8] sm:$0xff]   ;;  %v1010_v0 = vld [vmem:[#allocation8 + $0x50] sm:$0xff]   ;;  %p1109_p9 = por %p1108_p8, %p1107_p7 }
  0x46   :  { %405 = vmatpush1.bf16.msra.mxu0 %v962_v17  ;;  %v1004_v58 = vld [vmem:[#allocation8 + $0x20] sm:$0xff]   ;;  %v1008_v62 = vld [vmem:[#allocation8 + $0x18] sm:$0xff]   ;;  %v1011_v1 = vld [vmem:[#allocation8 + $0xd0] sm:$0xff]   ;;  %v183_v17 = vsub.s32 1, %v178_v13 }
  0x47   :  { %406 = vmatprep.subr.bf16.mxu0 %v970_v20  ;;  %v1005_v59 = vld [vmem:[#allocation8 + $0xa0] sm:$0xff]   ;;  %v1009_v63 = vld [vmem:[#allocation8 + $0x98] sm:$0xff]   ;;  %v1012_v2 = vld [vmem:[#allocation8 + $0x10] sm:$0xff]   ;;  %p1110_p10 = pnand %p1109_p9, %p1103_p6 }
  0x48   :  { %366 = vmatpush1.bf16.msra.mxu1 %v971_v22  ;;  %v1013_v3 = vld [vmem:[#allocation8 + $0x90] sm:$0xff]   ;;  %v1014_v4 = vld [vmem:[#allocation8 + $0x48] sm:$0xff]   ;;  %v1018_v8 = vld [vmem:[#allocation8 + $0x40] sm:$0xff]  }
  0x49   :  { %367 = vmatprep.subr.bf16.mxu1 %v972_v23  ;;  %v1015_v5 = vld [vmem:[#allocation8 + $0xc8] sm:$0xff]   ;;  %v1019_v9 = vld [vmem:[#allocation8 + $0xc0] sm:$0xff]   ;;  %v175_v16 = vld [vmem:[%s1216_s4] sm:$0xf] }
  0x4a   :  { %407 = vmatpush1.bf16.msra.mxu0 %v968_v21  ;;  %v1016_v6 = vld [vmem:[#allocation8 + $0x8] sm:$0xff]   ;;  %v1020_v10 = vld [vmem:[#allocation8] sm:$0xff]   ;;  %v180_v19 = vrot.slane %v175_v16, %v179_v14  ;;  %v188_v20 = vrot.slane %v175_v16, %v187_v15  ;;  %v184_v21 = vrot.slane %v175_v16, %v183_v17  ;;  %v192_v22 = vrot.slane %v175_v16, %v191_v18 }
  0x4b   :  { %408 = vmatprep.subr.bf16.mxu0 %v976_v24  ;;  %v1017_v7 = vld [vmem:[#allocation8 + $0x88] sm:$0xff]   ;;  %v1021_v11 = vld [vmem:[#allocation8 + $0x80] sm:$0xff]  }
  0x4c   :  { %368 = vmatpush1.bf16.msra.mxu1 %v977_v26 }
  0x4d   :  { %369 = vmatprep.subr.bf16.mxu1 %v978_v27 }
  0x4e   :  { %409 = vmatpush1.bf16.msra.mxu0 %v974_v25 }
  0x4f   :  { %410 = vmatprep.subr.bf16.mxu0 %v982_v28 }
  0x50   :  { %370 = vmatpush1.bf16.msra.mxu1 %v983_v30 }
  0x51   :  { %371 = vmatprep.subr.bf16.mxu1 %v984_v31 }
  0x52   :  { %411 = vmatpush1.bf16.msra.mxu0 %v980_v29 }
  0x53   :  { %412 = vmatprep.subr.bf16.mxu0 %v988_v32 }
  0x54   :  { %372 = vmatpush1.bf16.msra.mxu1 %v989_v34 }
  0x55   :  { %879 = vmatprep.subr.bf16.mxu1 %v990_v36 }
  0x56   :  { %413 = vmatpush1.bf16.msra.mxu0 %v986_v33 }
  0x57   :  { %901 = vmatprep.subr.bf16.mxu0 %v991_v37 }
  0xf9   :  { %v135_v39 = vpop.f32.mrf.mxu0 }
  0xfa   :  { %v136_v40 = vadd.f32 %v809_v38, %v135_v39 }
  0xfb   :  { %v927_v41 = vpop.f32.mrf.mxu0 }
  0xfc   :  { %v141_v42 = vmax.f32 %v136_v40, 0.0 }
  0xfd   :  { %v138_v43 = vpop.f32.mrf.mxu0 }
  0xfe   :  { %v142_v46 = vpack.c.bf16 %v141_v42, %v141_v42 }
  0xff   :  { %v928_v49 = vpop.f32.mrf.mxu0 }
 0x100   :  { %390 = vmatmul.mubr.bf16.vlgmr.msra.gmra.mxu1 %v142_v46  ;;  %431 = vmatmul.mubr.bf16.vlgmr.msra.gmra.mxu0 %v142_v46 }
 0x101   :  { %880 = vmatpush3.bf16.msra.mxu1 %v992_v44  ;;  %902 = vmatpush3.bf16.msra.mxu0 %v993_v45  ;;  %v844_v45 = vld [vmem:[%s1218_s6] ss:$0 sm:$0xff] }
 0x102   :  { %881 = vmatprep.subr.bf16.mxu1 %v994_v47  ;;  %903 = vmatprep.subr.bf16.mxu0 %v995_v48 }
 0x105   :  { %882 = vmatpush3.bf16.msra.mxu1 %v996_v50  ;;  %904 = vmatpush3.bf16.msra.mxu0 %v997_v51 }
 0x106   :  { %883 = vmatprep.subr.bf16.mxu1 %v998_v52  ;;  %905 = vmatprep.subr.bf16.mxu0 %v999_v53 }
 0x109   :  { %884 = vmatpush3.bf16.msra.mxu1 %v1000_v54  ;;  %906 = vmatpush3.bf16.msra.mxu0 %v1001_v55 }
 0x10a   :  { %885 = vmatprep.subr.bf16.mxu1 %v1002_v56  ;;  %907 = vmatprep.subr.bf16.mxu0 %v1003_v57 }
 0x10d   :  { %886 = vmatpush3.bf16.msra.mxu1 %v1004_v58  ;;  %908 = vmatpush3.bf16.msra.mxu0 %v1005_v59 }
 0x10e   :  { %887 = vmatprep.subr.bf16.mxu1 %v1006_v60  ;;  %909 = vmatprep.subr.bf16.mxu0 %v1007_v61 }
 0x111   :  { %888 = vmatpush3.bf16.msra.mxu1 %v1008_v62  ;;  %910 = vmatpush3.bf16.msra.mxu0 %v1009_v63 }
 0x112   :  { %889 = vmatprep.subr.bf16.mxu1 %v1010_v0  ;;  %911 = vmatprep.subr.bf16.mxu0 %v1011_v1 }
 0x115   :  { %890 = vmatpush3.bf16.msra.mxu1 %v1012_v2  ;;  %912 = vmatpush3.bf16.msra.mxu0 %v1013_v3 }
 0x116   :  { %891 = vmatprep.subr.bf16.mxu1 %v1014_v4  ;;  %913 = vmatprep.subr.bf16.mxu0 %v1015_v5 }
 0x119   :  { %892 = vmatpush3.bf16.msra.mxu1 %v1016_v6  ;;  %914 = vmatpush3.bf16.msra.mxu0 %v1017_v7 }
 0x11a   :  { %893 = vmatprep.subr.bf16.mxu1 %v1018_v8  ;;  %915 = vmatprep.subr.bf16.mxu0 %v1019_v9 }
 0x11d   :  { %894 = vmatpush3.bf16.msra.mxu1 %v1020_v10  ;;  %916 = vmatpush3.bf16.msra.mxu0 %v1021_v11 }
 0x1c0   :  { %v391_v23 = vpop.f32.mrf.mxu1  ;;  %v432_v24 = vpop.f32.mrf.mxu0 }
 0x1c1   :  { %v392_v25 = vadd.f32 %v391_v23, %v180_v19  ;;  %v433_v26 = vadd.f32 %v432_v24, %v188_v20 }
 0x1c2   :  { %v393_v27 = vpop.f32.mrf.mxu1  ;;  %v434_v28 = vpop.f32.mrf.mxu0 }
 0x1c3   :  { %v394_v29 = vadd.f32 %v393_v27, %v184_v21  ;;  %v435_v30 = vadd.f32 %v434_v28, %v192_v22  ;;  %v439_v31 = vmax.f32 %v392_v25, 0.0  ;;  %v441_v32 = vmax.f32 %v433_v26, 0.0 }
 0x1c4   :  { %v395_v33 = vpop.f32.mrf.mxu1  ;;  %v436_v34 = vpop.f32.mrf.mxu0 }
 0x1c5   :  { %v440_v35 = vmax.f32 %v394_v29, 0.0  ;;  %v442_v36 = vmax.f32 %v435_v30, 0.0  ;;  %v443_v41 = vpack.c.bf16 %v439_v31, %v439_v31  ;;  %v445_v42 = vpack.c.bf16 %v441_v32, %v441_v32 }
 0x1c6   :  { %v396_v37 = vpop.f32.mrf.mxu1  ;;  %v437_v38 = vpop.f32.mrf.mxu0 }
 0x1c7   :  { %v444_v39 = vpack.c.bf16 %v440_v35, %v440_v35  ;;  %v446_v40 = vpack.c.bf16 %v442_v36, %v442_v36 }
 0x1c9   :  { %742 = vmatprep.mubr.bf16.mxu1 %v444_v39  ;;  %782 = vmatprep.mubr.bf16.mxu0 %v446_v40 }
 0x1ca   :  { %743 = vmatmul.mubr.bf16.vlgmr.msra.gmra.mxu1 %v443_v41  ;;  %783 = vmatmul.mubr.bf16.vlgmr.msra.gmra.mxu0 %v445_v42 }
 0x28a   :  { %v895_v43 = vpop.f32.mrf.mxu1  ;;  %v917_v44 = vpop.f32.mrf.mxu0 }
 0x28c   :  { %v896_v46 = vpop.f32.mrf.mxu1  ;;  %v918_v47 = vpop.f32.mrf.mxu0 }
 0x28d   :  { %v897_v48 = vadd.f32 %v896_v46, %v895_v43  ;;  %v919_v52 = vadd.f32 %v918_v47, %v917_v44 }
 0x28e   :  { %v898_v49 = vpop.f32.mrf.mxu1  ;;  %v920_v50 = vpop.f32.mrf.mxu0 }
 0x28f   :  { %v745_v51 = vadd.f32 %v897_v48, %v844_v45 }
 0x290   :  { %v899_v53 = vpop.f32.mrf.mxu1  ;;  %v921_v54 = vpop.f32.mrf.mxu0 }
 0x291   :  { %v785_v55 = vadd.f32 %v919_v52, %v745_v51 }
 0x293   :  { %v790_v56 = vpack.c.bf16 %v785_v55, %v785_v55 }
 0x295   :  { %791 = vst [vmem:[#allocation10] sm:$0xf] %v790_v56 }
 0x296   :  { %1113 = shalt.err (!%p1110_p10)
}
 0x297   :  { %801 = dma.vmem_to_hbm [thread:$0]  %s799_s26, 64, %s1219_s7, [#allocation4]  }
 0x298   :  { %1128 = dma.done.wait [#allocation4], 64  }
 0x299   :  { %1129 = vsyncadd [#allocation4], 4294967232 }
 0x29a   :  { %805 = vsyncpa [#allocation3], 1 }
 0x29b   :  { %806 = vsyncpa [#allocation6], 1 }
 0x29c   :  { %807 = vsyncpa [#allocation9], 1 }
 0x29d   :  { %808 = vsyncpa [#allocation4], 1 }

</bundles_post_ra>
